<compile_context>
chip_gen: v7x
topology: tpu7x:2x2x1
jax: 0.10.0
libtpu: 0.0.40
codegen_flags: <defaults>
</compile_context>

<pallas_src>
import jax
import jax.numpy as jnp
from jax import lax
from jax.experimental import pallas as pl
from jax.experimental.pallas import tpu as pltpu


def _ce_min_kernel(logits_ref, tgt_ref, loss_ref):
    # logits_ref: (B, N, C) in the input dtype (class axis lane-dense).
    # tgt_ref:    (R, B, N) int32 targets, -1 == ignore.
    # loss_ref:   (1, 1) f32 — mean over batch of (min over rotations of the masked CE).
    logits = logits_ref[...]                          # keep native dtype (bf16 stays bf16)
    tgt = tgt_ref[...]
    B, N, C = logits.shape
    R = tgt.shape[0]

    # Stable logsumexp over the class (lane) axis, in f32, shared across rotations.
    lf32 = logits.astype(jnp.float32)
    m = jnp.max(lf32, axis=-1, keepdims=True)                                   # (B, N, 1)
    lse = (m + jnp.log(jnp.sum(jnp.exp(lf32 - m), axis=-1, keepdims=True)))[..., 0]  # (B, N)

    # One-hot class ids, materialized once (broadcast_in_dim is not CSE'd by JAX).
    class_ids = lax.broadcasted_iota(jnp.int32, (B, N, C), 2)                   # (B, N, C)
    zero = jnp.zeros((), dtype=logits.dtype)

    best = None
    for r in range(R):                                 # R is small and static
        t = tgt[r]                                     # (B, N)
        valid = (t >= 0).astype(jnp.float32)           # (B, N)
        # One-hot gather of logits[b, n, t[b, n]]; compare/select in the input dtype.
        onehot = class_ids == t[:, :, None]            # (B, N, C)
        picked = jnp.sum(jnp.where(onehot, logits, zero), axis=-1).astype(jnp.float32)  # (B, N)
        # Ignored targets (-1): onehot is all-false -> picked == 0; valid == 0 zeroes the term.
        nll_sum = jnp.sum(valid * (lse - picked), axis=-1, keepdims=True)       # (B, 1)
        cnt = jnp.sum(valid, axis=-1, keepdims=True)                            # (B, 1)
        # cnt == 0 (all targets ignored for a rotation) yields NaN, exactly as F.cross_entropy.
        loss_r = nll_sum / cnt                                                  # (B, 1)
        best = loss_r if best is None else jnp.minimum(best, loss_r)            # NaN propagates

    # Mean over batch, emitted as a single lane-trivial (1, 1) scalar.
    loss_ref[...] = jnp.sum(best, axis=0, keepdims=True) * (1.0 / B)


def correspondence_criterion(inputs, outputs):
    """inputs: tuple where inputs[1] = kp_indexs (B, R, N) int; outputs: (B, C, N) logits."""
    kp_indexs = inputs[1]
    B, C, N = outputs.shape
    _, R, _ = kp_indexs.shape

    # Layout plumbing (outside the kernel): put the class axis last so it is lane-dense,
    # and rotations leading on the targets so each rotation is a cheap leading-axis slice.
    logits_bnc = jnp.transpose(outputs, (0, 2, 1))                       # (B, N, C)
    tgt_rbn = jnp.transpose(kp_indexs.astype(jnp.int32), (1, 0, 2))      # (R, B, N)

    itemsize = jnp.dtype(outputs.dtype).itemsize
    cost = pl.CostEstimate(
        flops=B * N * C * (2 * R + 4),        # compares/selects/reduces + logsumexp adds
        transcendentals=B * N * C,            # exp per logit
        bytes_accessed=B * N * C * itemsize + R * B * N * 4 + 4,
    )

    loss = pl.pallas_call(
        _ce_min_kernel,
        out_shape=jax.ShapeDtypeStruct((1, 1), jnp.float32),
        # No grid: single invocation, whole arrays resident in VMEM (no useless double-buffering).
        in_specs=[
            pl.BlockSpec(memory_space=pltpu.MemorySpace.VMEM),
            pl.BlockSpec(memory_space=pltpu.MemorySpace.VMEM),
        ],
        out_specs=pl.BlockSpec(memory_space=pltpu.MemorySpace.VMEM),
        cost_estimate=cost,
    )(logits_bnc, tgt_rbn)

    return loss[0, 0]


def _reference(inputs, outputs):
    """Pure-JAX reference mirroring the PyTorch loop."""
    kp_indexs = inputs[1]
    B, C, N = outputs.shape
    _, R, _ = kp_indexs.shape
    logz = jax.scipy.special.logsumexp(outputs.astype(jnp.float32), axis=1)   # (B, N)
    per_batch = []
    for b in range(B):
        rot_losses = []
        for r in range(R):
            t = kp_indexs[b, r]
            valid = t >= 0
            picked = outputs[b, jnp.clip(t, 0, C - 1), jnp.arange(N)].astype(jnp.float32)
            nll = jnp.where(valid, logz[b] - picked, 0.0)
            rot_losses.append(jnp.sum(nll) / jnp.sum(valid.astype(jnp.float32)))
        per_batch.append(jnp.min(jnp.stack(rot_losses)))
    return jnp.mean(jnp.stack(per_batch))


if __name__ == "__main__":
    B, C, N, R = 2, 32, 16, 4   # batch, classes, keypoint positions, rotations

    key = jax.random.PRNGKey(0)
    k_logits, k_tgt = jax.random.split(key)

    outputs = jax.random.normal(k_logits, (B, C, N), dtype=jnp.float32)
    # targets in [-1, C); -1 entries are ignored (ignore_index=-1)
    kp_indexs = jax.random.randint(k_tgt, (B, R, N), -1, C, dtype=jnp.int32)
    inputs = (None, kp_indexs)   # the module only reads inputs[1]

    loss = jax.block_until_ready(correspondence_criterion(inputs, outputs))
    ref = jax.block_until_ready(_reference(inputs, outputs))
    assert jnp.allclose(loss, ref, rtol=1e-5, atol=1e-5), (loss, ref)

    print("KERNEL_OK")
</pallas_src>

<mosaic_0001>
module attributes {stable_mosaic.version = 11 : i64} {
  func.func @_ce_min_kernel(%arg0: memref<2x16x32xf32, #tpu.memory_space<vmem>>, %arg1: memref<4x2x16xi32, #tpu.memory_space<vmem>>, %arg2: memref<1x1xf32, #tpu.memory_space<vmem>>) attributes {dimension_semantics = [], scalar_prefetch = 0 : i64, scratch_operands = 0 : i64, tpu.core_type = #tpu.core_type<tc>} {
    %c0 = arith.constant 0 : index
    %c0_0 = arith.constant 0 : index
    %c0_1 = arith.constant 0 : index
    %0 = vector.load %arg0[%c0, %c0_0, %c0_1] : memref<2x16x32xf32, #tpu.memory_space<vmem>>, vector<2x16x32xf32>
    %c0_2 = arith.constant 0 : index
    %c0_3 = arith.constant 0 : index
    %c0_4 = arith.constant 0 : index
    %1 = vector.load %arg1[%c0_2, %c0_3, %c0_4] : memref<4x2x16xi32, #tpu.memory_space<vmem>>, vector<4x2x16xi32>
    %cst = arith.constant dense<0xFF800000> : vector<2x16xf32>
    %2 = vector.multi_reduction <maximumf>, %0, %cst [2] : vector<2x16x32xf32> to vector<2x16xf32>
    %3 = vector.shape_cast %2 : vector<2x16xf32> to vector<2x16x1xf32>
    %4 = vector.broadcast %3 : vector<2x16x1xf32> to vector<2x16x32xf32>
    %5 = arith.subf %0, %4 : vector<2x16x32xf32>
    %6 = math.exp %5 : vector<2x16x32xf32>
    %cst_5 = arith.constant dense<0.000000e+00> : vector<2x16xf32>
    %7 = vector.multi_reduction <add>, %6, %cst_5 [2] : vector<2x16x32xf32> to vector<2x16xf32>
    %8 = vector.shape_cast %7 : vector<2x16xf32> to vector<2x16x1xf32>
    %9 = math.log %8 : vector<2x16x1xf32>
    %10 = arith.addf %3, %9 : vector<2x16x1xf32>
    %11 = vector.shape_cast %10 : vector<2x16x1xf32> to vector<2x16xf32>
    %12 = tpu.iota {dimensions = array<i32: 2>} : vector<2x16x32xi32>
    %13 = vector.extract_strided_slice %1 {offsets = [0, 0, 0], sizes = [1, 2, 16], strides = [1, 1, 1]} : vector<4x2x16xi32> to vector<1x2x16xi32>
    %14 = vector.shape_cast %13 : vector<1x2x16xi32> to vector<2x16xi32>
    %c0_i32 = arith.constant 0 : i32
    %15 = vector.broadcast %c0_i32 : i32 to vector<2x16xi32>
    %16 = arith.cmpi sge, %14, %15 : vector<2x16xi32>
    %17 = arith.extui %16 : vector<2x16xi1> to vector<2x16xi32>
    %18 = arith.sitofp %17 : vector<2x16xi32> to vector<2x16xf32>
    %19 = vector.shape_cast %14 : vector<2x16xi32> to vector<2x16x1xi32>
    %20 = vector.broadcast %19 : vector<2x16x1xi32> to vector<2x16x32xi32>
    %21 = arith.cmpi eq, %12, %20 : vector<2x16x32xi32>
    %cst_6 = arith.constant 0.000000e+00 : f32
    %22 = vector.broadcast %cst_6 : f32 to vector<2x16x32xf32>
    %23 = arith.select %21, %0, %22 : vector<2x16x32xi1>, vector<2x16x32xf32>
    %cst_7 = arith.constant dense<0.000000e+00> : vector<2x16xf32>
    %24 = vector.multi_reduction <add>, %23, %cst_7 [2] : vector<2x16x32xf32> to vector<2x16xf32>
    %25 = arith.subf %11, %24 : vector<2x16xf32>
    %26 = arith.mulf %18, %25 : vector<2x16xf32>
    %cst_8 = arith.constant dense<0.000000e+00> : vector<2xf32>
    %27 = vector.multi_reduction <add>, %26, %cst_8 [1] : vector<2x16xf32> to vector<2xf32>
    %28 = vector.shape_cast %27 : vector<2xf32> to vector<2x1xf32>
    %cst_9 = arith.constant dense<0.000000e+00> : vector<2xf32>
    %29 = vector.multi_reduction <add>, %18, %cst_9 [1] : vector<2x16xf32> to vector<2xf32>
    %30 = vector.shape_cast %29 : vector<2xf32> to vector<2x1xf32>
    %31 = arith.divf %28, %30 : vector<2x1xf32>
    %32 = vector.extract_strided_slice %1 {offsets = [1, 0, 0], sizes = [1, 2, 16], strides = [1, 1, 1]} : vector<4x2x16xi32> to vector<1x2x16xi32>
    %33 = vector.shape_cast %32 : vector<1x2x16xi32> to vector<2x16xi32>
    %c0_i32_10 = arith.constant 0 : i32
    %34 = vector.broadcast %c0_i32_10 : i32 to vector<2x16xi32>
    %35 = arith.cmpi sge, %33, %34 : vector<2x16xi32>
    %36 = arith.extui %35 : vector<2x16xi1> to vector<2x16xi32>
    %37 = arith.sitofp %36 : vector<2x16xi32> to vector<2x16xf32>
    %38 = vector.shape_cast %33 : vector<2x16xi32> to vector<2x16x1xi32>
    %39 = vector.broadcast %38 : vector<2x16x1xi32> to vector<2x16x32xi32>
    %40 = arith.cmpi eq, %12, %39 : vector<2x16x32xi32>
    %cst_11 = arith.constant 0.000000e+00 : f32
    %41 = vector.broadcast %cst_11 : f32 to vector<2x16x32xf32>
    %42 = arith.select %40, %0, %41 : vector<2x16x32xi1>, vector<2x16x32xf32>
    %cst_12 = arith.constant dense<0.000000e+00> : vector<2x16xf32>
    %43 = vector.multi_reduction <add>, %42, %cst_12 [2] : vector<2x16x32xf32> to vector<2x16xf32>
    %44 = arith.subf %11, %43 : vector<2x16xf32>
    %45 = arith.mulf %37, %44 : vector<2x16xf32>
    %cst_13 = arith.constant dense<0.000000e+00> : vector<2xf32>
    %46 = vector.multi_reduction <add>, %45, %cst_13 [1] : vector<2x16xf32> to vector<2xf32>
    %47 = vector.shape_cast %46 : vector<2xf32> to vector<2x1xf32>
    %cst_14 = arith.constant dense<0.000000e+00> : vector<2xf32>
    %48 = vector.multi_reduction <add>, %37, %cst_14 [1] : vector<2x16xf32> to vector<2xf32>
    %49 = vector.shape_cast %48 : vector<2xf32> to vector<2x1xf32>
    %50 = arith.divf %47, %49 : vector<2x1xf32>
    %51 = arith.minimumf %31, %50 : vector<2x1xf32>
    %52 = vector.extract_strided_slice %1 {offsets = [2, 0, 0], sizes = [1, 2, 16], strides = [1, 1, 1]} : vector<4x2x16xi32> to vector<1x2x16xi32>
    %53 = vector.shape_cast %52 : vector<1x2x16xi32> to vector<2x16xi32>
    %c0_i32_15 = arith.constant 0 : i32
    %54 = vector.broadcast %c0_i32_15 : i32 to vector<2x16xi32>
    %55 = arith.cmpi sge, %53, %54 : vector<2x16xi32>
    %56 = arith.extui %55 : vector<2x16xi1> to vector<2x16xi32>
    %57 = arith.sitofp %56 : vector<2x16xi32> to vector<2x16xf32>
    %58 = vector.shape_cast %53 : vector<2x16xi32> to vector<2x16x1xi32>
    %59 = vector.broadcast %58 : vector<2x16x1xi32> to vector<2x16x32xi32>
    %60 = arith.cmpi eq, %12, %59 : vector<2x16x32xi32>
    %cst_16 = arith.constant 0.000000e+00 : f32
    %61 = vector.broadcast %cst_16 : f32 to vector<2x16x32xf32>
    %62 = arith.select %60, %0, %61 : vector<2x16x32xi1>, vector<2x16x32xf32>
    %cst_17 = arith.constant dense<0.000000e+00> : vector<2x16xf32>
    %63 = vector.multi_reduction <add>, %62, %cst_17 [2] : vector<2x16x32xf32> to vector<2x16xf32>
    %64 = arith.subf %11, %63 : vector<2x16xf32>
    %65 = arith.mulf %57, %64 : vector<2x16xf32>
    %cst_18 = arith.constant dense<0.000000e+00> : vector<2xf32>
    %66 = vector.multi_reduction <add>, %65, %cst_18 [1] : vector<2x16xf32> to vector<2xf32>
    %67 = vector.shape_cast %66 : vector<2xf32> to vector<2x1xf32>
    %cst_19 = arith.constant dense<0.000000e+00> : vector<2xf32>
    %68 = vector.multi_reduction <add>, %57, %cst_19 [1] : vector<2x16xf32> to vector<2xf32>
    %69 = vector.shape_cast %68 : vector<2xf32> to vector<2x1xf32>
    %70 = arith.divf %67, %69 : vector<2x1xf32>
    %71 = arith.minimumf %51, %70 : vector<2x1xf32>
    %72 = vector.extract_strided_slice %1 {offsets = [3, 0, 0], sizes = [1, 2, 16], strides = [1, 1, 1]} : vector<4x2x16xi32> to vector<1x2x16xi32>
    %73 = vector.shape_cast %72 : vector<1x2x16xi32> to vector<2x16xi32>
    %c0_i32_20 = arith.constant 0 : i32
    %74 = vector.broadcast %c0_i32_20 : i32 to vector<2x16xi32>
    %75 = arith.cmpi sge, %73, %74 : vector<2x16xi32>
    %76 = arith.extui %75 : vector<2x16xi1> to vector<2x16xi32>
    %77 = arith.sitofp %76 : vector<2x16xi32> to vector<2x16xf32>
    %78 = vector.shape_cast %73 : vector<2x16xi32> to vector<2x16x1xi32>
    %79 = vector.broadcast %78 : vector<2x16x1xi32> to vector<2x16x32xi32>
    %80 = arith.cmpi eq, %12, %79 : vector<2x16x32xi32>
    %cst_21 = arith.constant 0.000000e+00 : f32
    %81 = vector.broadcast %cst_21 : f32 to vector<2x16x32xf32>
    %82 = arith.select %80, %0, %81 : vector<2x16x32xi1>, vector<2x16x32xf32>
    %cst_22 = arith.constant dense<0.000000e+00> : vector<2x16xf32>
    %83 = vector.multi_reduction <add>, %82, %cst_22 [2] : vector<2x16x32xf32> to vector<2x16xf32>
    %84 = arith.subf %11, %83 : vector<2x16xf32>
    %85 = arith.mulf %77, %84 : vector<2x16xf32>
    %cst_23 = arith.constant dense<0.000000e+00> : vector<2xf32>
    %86 = vector.multi_reduction <add>, %85, %cst_23 [1] : vector<2x16xf32> to vector<2xf32>
    %87 = vector.shape_cast %86 : vector<2xf32> to vector<2x1xf32>
    %cst_24 = arith.constant dense<0.000000e+00> : vector<2xf32>
    %88 = vector.multi_reduction <add>, %77, %cst_24 [1] : vector<2x16xf32> to vector<2xf32>
    %89 = vector.shape_cast %88 : vector<2xf32> to vector<2x1xf32>
    %90 = arith.divf %87, %89 : vector<2x1xf32>
    %91 = arith.minimumf %71, %90 : vector<2x1xf32>
    %cst_25 = arith.constant dense<0.000000e+00> : vector<1xf32>
    %92 = vector.multi_reduction <add>, %91, %cst_25 [0] : vector<2x1xf32> to vector<1xf32>
    %93 = vector.shape_cast %92 : vector<1xf32> to vector<1x1xf32>
    %cst_26 = arith.constant 5.000000e-01 : f32
    %94 = vector.broadcast %cst_26 : f32 to vector<1x1xf32>
    %95 = arith.mulf %93, %94 : vector<1x1xf32>
    %c0_27 = arith.constant 0 : index
    %c0_28 = arith.constant 0 : index
    %96 = vector.load %arg2[%c0_27, %c0_28] : memref<1x1xf32, #tpu.memory_space<vmem>>, vector<1x1xf32>
    tpu.vector_store %arg2[%c0_27, %c0_28], %95 {strides = array<i32>} : memref<1x1xf32, #tpu.memory_space<vmem>>, vector<1x1xf32>,
    return
  }
}

</mosaic_0001>

<bundles_post_ra>
// kernel: tpu_custom_call.1
= control target key start
LH: loop header
LB: loop body
LE: loop exit
PB: predicated region body
PF: predicated region fallthrough
CT: control target
= control target key end

     0   :  { %7 = vsyncpa [#allocation3], 0  ;;  %s782_s0 = inlined_call_operand.hbm [shape: f32[2,16,32], index: 0, kind: input, shape index: {}]   ;;  %s783_s1 = inlined_call_operand.hbm [shape: s32[4,2,16], index: 1, kind: input, shape index: {}]   ;;  %s784_s2 = inlined_call_operand.hbm [shape: f32[1,1], index: 2, kind: output, shape index: {}]  }
   0x1   :  { %8 = vsyncpa [#allocation6], 0 }
   0x2   :  { %9 = vsyncpa [#allocation4], 0  ;;  %s569_s9 = smov [#allocation2]   ;;  %s497_s13 = scalar_lea.hbm %s782_s0, 512 }
   0x3   :  { %s15_s10 = sshll.u32 %s569_s9, 4  ;;  %p498_p0 = scmp.ne.s32.totalorder %s782_s0, %s497_s13  ;;  %s16_s10 = int_to_ptr.vmem [resolvable:$true] %s15_s10 }
   0x4   :  { %p501_p1 = scmp.lt.u32.totalorder %s497_s13, %s782_s0 }
   0x6   :  { %p503_p2 = pnand %p501_p1, %p498_p0 }
   0x8   :  { %506 = shalt.err (!%p503_p2)
}
   0x9   :  { %s507_s18 = scalar_lea.vmem %s16_s10, 512  ;;  %p512_p4 = scmp.lt.s32.totalorder %s16_s10, %s16_s10 }
   0xa   :  { %p508_p3 = scmp.ne.s32.totalorder %s16_s10, %s507_s18  ;;  %p513_p5 = scmp.lt.s32.totalorder %s507_s18, %s507_s18 }
   0xc   :  { %p514_p6 = por %p513_p5, %p512_p4 }
   0xe   :  { %p515_p7 = pnand %p514_p6, %p508_p3 }
  0x10   :  { %518 = shalt.err (!%p515_p7)
}
  0x11   :  { %s570_s19 = smov 128   ;;  %s571_s20 = smov 8  }
  0x12   :  { %21 = dma.hbm_to_vmem [thread:$0]  %s782_s0, 512, %s16_s10, [#allocation3], %s570_s19, %s570_s19, %s571_s20  }
  0x13   :  { %s572_s23 = smov [#allocation5]   ;;  %s519_s27 = scalar_lea.hbm %s783_s1, 128 }
  0x14   :  { %s27_s24 = sshll.u32 %s572_s23, 4  ;;  %p520_p8 = scmp.ne.s32.totalorder %s783_s1, %s519_s27  ;;  %s28_s24 = int_to_ptr.vmem [resolvable:$true] %s27_s24 }
  0x15   :  { %p523_p9 = scmp.lt.u32.totalorder %s519_s27, %s783_s1 }
  0x17   :  { %p525_p10 = pnand %p523_p9, %p520_p8 }
  0x19   :  { %528 = shalt.err (!%p525_p10)
}
  0x1a   :  { %s529_s4 = scalar_lea.vmem %s28_s24, 128  ;;  %p534_p12 = scmp.lt.s32.totalorder %s28_s24, %s28_s24 }
  0x1b   :  { %p530_p11 = scmp.ne.s32.totalorder %s28_s24, %s529_s4  ;;  %p535_p13 = scmp.lt.s32.totalorder %s529_s4, %s529_s4 }
  0x1d   :  { %p536_p0 = por %p535_p13, %p534_p12 }
  0x1f   :  { %p537_p1 = pnand %p536_p0, %p530_p11 }
  0x21   :  { %540 = shalt.err (!%p537_p1)
}
  0x22   :  { %s573_s0 = smov 32   ;;  %s574_s5 = smov 2  }
  0x23   :  { %33 = dma.hbm_to_vmem [thread:$0]  %s783_s1, 128, %s28_s24, [#allocation6], %s573_s0, %s573_s0, %s574_s5  }
  0x24   :  { %563 = dma.done.wait [#allocation3], 512  }
  0x25   :  { %564 = vsyncadd [#allocation3], 4294966784 }
  0x26   :  { %565 = dma.done.wait [#allocation6], 128  }
  0x27   :  { %566 = vsyncadd [#allocation6], 4294967168  ;;  %vm48_vm0 = vcmask 261120   ;;  %v616_v0 = vld [vmem:[#allocation2 + $0x10] sm:$0xff]  ;;  %v618_v1 = vld [vmem:[#allocation2] sm:$0xff]  ;;  %v97_v8 = vlaneseq  ;;  %s576_s1 = smov [#allocation7]  }
  0x28   :  { %v620_v2 = vld [vmem:[#allocation2 + $0x18] sm:$0xff]  ;;  %v55_v3 = vsel %vm48_vm0, %v616_v0, -inf  ;;  %v49_v4 = vsel %vm48_vm0, %v618_v1, -inf  ;;  %v626_v5 = vld [vmem:[#allocation2 + $0x8] sm:$0xff]  ;;  %v635_v11 = vld [vmem:[#allocation5] sm:$0x3] }
  0x29   :  { %56 = vmax.xlane.f32.xlu1 %v55_v3  ;;  %50 = vmax.xlane.f32.xlu0 %v49_v4  ;;  %v58_v6 = vsel %vm48_vm0, %v620_v2, -inf  ;;  %v52_v7 = vsel %vm48_vm0, %v626_v5, -inf  ;;  %v632_v9 = vshrl.u32 %v97_v8, 7  ;;  %v640_v15 = vld [vmem:[#allocation5 + $0x2] sm:$0x3]  ;;  %v662_v29 = vand.u32 127, %v97_v8 }
  0x2a   :  { %v644_v18 = vld [vmem:[#allocation5 + $0x4] sm:$0x3]  ;;  %v648_v21 = vld [vmem:[#allocation5 + $0x6] sm:$0x3]  ;;  %s451_s8 = sshll.u32 %s576_s1, 4  ;;  %s452_s8 = int_to_ptr.vmem [resolvable:$true] %s451_s8 }
  0x2b   :  { %v104_v10 = vsub.s32 0, %v632_v9  ;;  %v115_v13 = vsub.s32 1, %v632_v9  ;;  %s541_s9 = scalar_lea.vmem %s452_s8, 16  ;;  %s545_s10 = scalar_lea.vmem %s452_s8, 32 }
  0x2c   :  { %p542_p2 = scmp.ne.s32.totalorder %s452_s8, %s541_s9  ;;  %p546_p3 = scmp.lt.s32.totalorder %s452_s8, %s452_s8 }
  0x2d   :  { %59 = vmax.xlane.f32.xlu1 %v58_v6  ;;  %53 = vmax.xlane.f32.xlu0 %v52_v7  ;;  %v105_v12 = vrot.slane %v635_v11, %v104_v10  ;;  %v116_v14 = vrot.slane %v635_v11, %v115_v13  ;;  %v191_v16 = vrot.slane %v640_v15, %v104_v10  ;;  %p547_p4 = scmp.lt.s32.totalorder %s545_s10, %s541_s9 }
  0x2e   :  { %v202_v17 = vrot.slane %v640_v15, %v115_v13  ;;  %v274_v19 = vrot.slane %v644_v18, %v104_v10  ;;  %v285_v20 = vrot.slane %v644_v18, %v115_v13  ;;  %v357_v22 = vrot.slane %v648_v21, %v104_v10 }
  0x2f   :  { %v368_v23 = vrot.slane %v648_v21, %v115_v13  ;;  %p548_p5 = por %p547_p4, %p546_p3 }
  0x31   :  { %p549_p6 = pnand %p548_p5, %p542_p2 }
  0x3e   :  { %111 = vbcast.lane.b32.xlu1 %v105_v12, 264 }
  0x42   :  { %118 = vbcast.lane.b32.xlu1 %v116_v14, 256 }
  0x43   :  { %107 = vbcast.lane.b32.xlu0 %v105_v12, 256 }
  0x46   :  { %122 = vbcast.lane.b32.xlu1 %v116_v14, 264 }
  0x47   :  { %193 = vbcast.lane.b32.xlu0 %v191_v16, 256 }
  0x4a   :  { %197 = vbcast.lane.b32.xlu1 %v191_v16, 264 }
  0x4b   :  { %204 = vbcast.lane.b32.xlu0 %v202_v17, 256 }
  0x4e   :  { %208 = vbcast.lane.b32.xlu1 %v202_v17, 264 }
  0x4f   :  { %276 = vbcast.lane.b32.xlu0 %v274_v19, 256 }
  0x52   :  { %280 = vbcast.lane.b32.xlu1 %v274_v19, 264 }
  0x53   :  { %287 = vbcast.lane.b32.xlu0 %v285_v20, 256 }
  0x56   :  { %291 = vbcast.lane.b32.xlu1 %v285_v20, 264 }
  0x57   :  { %359 = vbcast.lane.b32.xlu0 %v357_v22, 256 }
  0x5a   :  { %363 = vbcast.lane.b32.xlu1 %v357_v22, 264 }
  0x5b   :  { %370 = vbcast.lane.b32.xlu0 %v368_v23, 256 }
  0x5e   :  { %374 = vbcast.lane.b32.xlu1 %v368_v23, 264 }
  0xb6   :  { %v652_v24 = vpop.xlane.xlu1 %56  ;;  %v654_v25 = vpop.xlane.xlu0 %50 }
  0xb7   :  { %v61_v26 = vsub.f32 %v618_v1, %v654_v25  ;;  %v63_v30 = vsub.f32 %v616_v0, %v652_v24 }
  0xb9   :  { %v65_v31 = vmul.f32 1.442695, %v61_v26  ;;  %v69_v35 = vmul.f32 1.442695, %v63_v30 }
  0xba   :  { %v658_v27 = vpop.xlane.xlu1 %59  ;;  %v660_v28 = vpop.xlane.xlu0 %53 }
  0xbb   :  { %v62_v32 = vsub.f32 %v626_v5, %v660_v28  ;;  %v64_v36 = vsub.f32 %v620_v2, %v658_v27  ;;  %473 = vpow2.f32 %v65_v31 }
  0xbc   :  { %475 = vpow2.f32 %v69_v35 }
  0xbd   :  { %v67_v37 = vmul.f32 1.442695, %v62_v32  ;;  %v71_v44 = vmul.f32 1.442695, %v64_v36 }
  0xbe   :  { %v112_v33 = vpop.permute.xlu1 %111  ;;  %v108_v34 = vpop.permute.xlu0 %107 }
  0xbf   :  { %vm125_vm1 = vcmp.eq.s32.totalorder %v662_v29, %v112_v33  ;;  %vm124_vm2 = vcmp.eq.s32.totalorder %v662_v29, %v108_v34  ;;  %477 = vpow2.f32 %v67_v37 }
  0xc0   :  { %v129_v38 = vsel %vm125_vm1, %v626_v5, 0.0  ;;  %v128_v39 = vsel %vm124_vm2, %v618_v1, 0.0  ;;  %479 = vpow2.f32 %v71_v44  ;;  %vm185_vm2 = vcmp.ge.s32.totalorder %v640_v15, 0 }
  0xc1   :  { %v135_v40 = vsel %vm48_vm0, %v129_v38, 0.0  ;;  %v132_v41 = vsel %vm48_vm0, %v128_v39, 0.0 }
  0xc2   :  { %v119_v42 = vpop.permute.xlu1 %118  ;;  %136 = vadd.xlane.f32.xlu1 %v135_v40  ;;  %133 = vadd.xlane.f32.xlu0 %v132_v41  ;;  %v194_v43 = vpop.permute.xlu0 %193 }
  0xc3   :  { %vm126_vm3 = vcmp.eq.s32.totalorder %v662_v29, %v119_v42  ;;  %vm210_vm4 = vcmp.eq.s32.totalorder %v662_v29, %v194_v43 }
  0xc4   :  { %v130_v45 = vsel %vm126_vm3, %v616_v0, 0.0  ;;  %v214_v46 = vsel %vm210_vm4, %v618_v1, 0.0  ;;  %vm99_vm3 = vcmp.ge.s32.totalorder %v635_v11, 0  ;;  %vm176_vm4 = vcmask 123904  }
  0xc5   :  { %v138_v47 = vsel %vm48_vm0, %v130_v45, 0.0  ;;  %v218_v50 = vsel %vm48_vm0, %v214_v46, 0.0  ;;  %v474_v53 = vpop.eup %473 }
  0xc6   :  { %v123_v48 = vpop.permute.xlu1 %122  ;;  %139 = vadd.xlane.f32.xlu0 %v138_v47  ;;  %v205_v49 = vpop.permute.xlu0 %204  ;;  %v73_v59 = vsel %vm48_vm0, %v474_v53, 0.0 }
  0xc7   :  { %vm127_vm5 = vcmp.eq.s32.totalorder %v662_v29, %v123_v48  ;;  %v476_v57 = vpop.eup %475  ;;  %vm212_vm8 = vcmp.eq.s32.totalorder %v662_v29, %v205_v49 }
  0xc8   :  { %v131_v51 = vsel %vm127_vm5, %v620_v2, 0.0  ;;  %v79_v3 = vsel %vm48_vm0, %v476_v57, 0.0  ;;  %v216_v12 = vsel %vm212_vm8, %v616_v0, 0.0  ;;  %vm351_vm5 = vcmp.ge.s32.totalorder %v648_v21, 0 }
  0xc9   :  { %v141_v52 = vsel %vm48_vm0, %v131_v51, 0.0  ;;  %v478_v60 = vpop.eup %477  ;;  %v224_v17 = vsel %vm48_vm0, %v216_v12, 0.0  ;;  %vm434_vm8 = vcmask 1041408  }
  0xca   :  { %v198_v54 = vpop.permute.xlu1 %197  ;;  %142 = vadd.xlane.f32.xlu1 %v141_v52  ;;  %219 = vadd.xlane.f32.xlu0 %v218_v50  ;;  %v277_v56 = vpop.permute.xlu0 %276  ;;  %v76_v63 = vsel %vm48_vm0, %v478_v60, 0.0 }
  0xcb   :  { %vm211_vm6 = vcmp.eq.s32.totalorder %v662_v29, %v198_v54  ;;  %v480_v4 = vpop.eup %479  ;;  %vm293_vm10 = vcmp.eq.s32.totalorder %v662_v29, %v277_v56 }
  0xcc   :  { %v215_v55 = vsel %vm211_vm6, %v626_v5, 0.0  ;;  %v82_v13 = vsel %vm48_vm0, %v480_v4, 0.0  ;;  %v297_v20 = vsel %vm293_vm10, %v618_v1, 0.0  ;;  %vm161_vm6 = vcmask 130112  }
  0xcd   :  { %v221_v58 = vsel %vm48_vm0, %v215_v55, 0.0  ;;  %v301_v30 = vsel %vm48_vm0, %v297_v20, 0.0 }
  0xce   :  { %222 = vadd.xlane.f32.xlu1 %v221_v58  ;;  %74 = vadd.xlane.f32.xlu0 %v73_v59  ;;  %v209_v61 = vpop.permute.xlu1 %208  ;;  %v288_v7 = vpop.permute.xlu0 %287 }
  0xcf   :  { %vm213_vm7 = vcmp.eq.s32.totalorder %v662_v29, %v209_v61  ;;  %vm295_vm12 = vcmp.eq.s32.totalorder %v662_v29, %v288_v7  ;;  %v156_v61 = vadd.s32 4294967288, %v662_v29  ;;  %v154_v7 = vsub.s32 %v662_v29, %v632_v9 }
  0xd0   :  { %v217_v62 = vsel %vm213_vm7, %v620_v2, 0.0  ;;  %v299_v32 = vsel %vm295_vm12, %v616_v0, 0.0  ;;  %vm172_vm7 = vcmask 1041409  }
  0xd1   :  { %v227_v8 = vsel %vm48_vm0, %v217_v62, 0.0  ;;  %v307_v36 = vsel %vm48_vm0, %v299_v32, 0.0 }
  0xd2   :  { %77 = vadd.xlane.f32.xlu1 %v76_v63  ;;  %80 = vadd.xlane.f32.xlu0 %v79_v3  ;;  %v281_v6 = vpop.permute.xlu1 %280  ;;  %v360_v22 = vpop.permute.xlu0 %359 }
  0xd3   :  { %vm294_vm9 = vcmp.eq.s32.totalorder %v662_v29, %v281_v6  ;;  %vm376_vm14 = vcmp.eq.s32.totalorder %v662_v29, %v360_v22 }
  0xd4   :  { %v298_v10 = vsel %vm294_vm9, %v626_v5, 0.0  ;;  %v380_v38 = vsel %vm376_vm14, %v618_v1, 0.0  ;;  %v575_v1 = vmov 0.0   ;;  %vm443_vm9 = vcmask 0  }
  0xd5   :  { %v304_v16 = vsel %vm48_vm0, %v298_v10, 0.0  ;;  %v384_v39 = vsel %vm48_vm0, %v380_v38, 0.0  ;;  %v726_v42 = vsel %vm99_vm3, 1.0, %v575_v1  ;;  %v738_v15 = vsel %vm351_vm5, 1.0, %v575_v1 }
  0xd6   :  { %228 = vadd.xlane.f32.xlu1 %v227_v8  ;;  %83 = vadd.xlane.f32.xlu0 %v82_v13  ;;  %v292_v14 = vpop.permute.xlu1 %291  ;;  %v371_v34 = vpop.permute.xlu0 %370  ;;  %v428_v45 = vsel %vm176_vm4, %v738_v15, 0.0  ;;  %v159_v13 = vsub.s32 %v156_v61, %v632_v9 }
  0xd7   :  { %vm296_vm11 = vcmp.eq.s32.totalorder %v662_v29, %v292_v14  ;;  %vm378_vm1 = vcmp.eq.s32.totalorder %v662_v29, %v371_v34 }
  0xd8   :  { %v300_v19 = vsel %vm296_vm11, %v620_v2, 0.0  ;;  %v382_v40 = vsel %vm378_vm1, %v616_v0, 0.0  ;;  %v180_v0 = vsel %vm176_vm4, %v726_v42, 0.0 }
  0xd9   :  { %v310_v26 = vsel %vm48_vm0, %v300_v19, 0.0  ;;  %v390_v41 = vsel %vm48_vm0, %v382_v40, 0.0 }
  0xda   :  { %305 = vadd.xlane.f32.xlu1 %v304_v16  ;;  %225 = vadd.xlane.f32.xlu0 %v224_v17  ;;  %v364_v23 = vpop.permute.xlu1 %363 }
  0xdb   :  { %vm377_vm13 = vcmp.eq.s32.totalorder %v662_v29, %v364_v23 }
  0xdc   :  { %v381_v31 = vsel %vm377_vm13, %v626_v5, 0.0 }
  0xdd   :  { %v387_v35 = vsel %vm48_vm0, %v381_v31, 0.0 }
  0xde   :  { %311 = vadd.xlane.f32.xlu1 %v310_v26  ;;  %302 = vadd.xlane.f32.xlu0 %v301_v30  ;;  %v375_v33 = vpop.permute.xlu1 %374 }
  0xdf   :  { %vm379_vm15 = vcmp.eq.s32.totalorder %v662_v29, %v375_v33 }
  0xe0   :  { %v383_v37 = vsel %vm379_vm15, %v620_v2, 0.0  ;;  %v724_v2 = vsel %vm185_vm2, 1.0, %v575_v1 }
  0xe1   :  { %v393_v5 = vsel %vm48_vm0, %v383_v37, 0.0  ;;  %v262_v43 = vsel %vm176_vm4, %v724_v2, 0.0  ;;  %vm268_vm0 = vcmp.ge.s32.totalorder %v644_v18, 0 }
  0xe2   :  { %388 = vadd.xlane.f32.xlu1 %v387_v35  ;;  %308 = vadd.xlane.f32.xlu0 %v307_v36  ;;  %v733_v44 = vsel %vm268_vm0, 1.0, %v575_v1 }
  0xe3   :  { %v345_v11 = vsel %vm176_vm4, %v733_v44, 0.0 }
  0xe6   :  { %394 = vadd.xlane.f32.xlu1 %v393_v5  ;;  %385 = vadd.xlane.f32.xlu0 %v384_v39 }
  0xea   :  { %391 = vadd.xlane.f32.xlu0 %v390_v41  ;;  %263 = vadd.xlane.f32.xlu1 %v262_v43 }
  0xee   :  { %181 = vadd.xlane.f32.xlu0 %v180_v0  ;;  %429 = vadd.xlane.f32.xlu1 %v428_v45 }
  0xf2   :  { %346 = vadd.xlane.f32.xlu0 %v345_v11 }
 0x14f   :  { %v134_v46 = vpop.xlane.xlu0 %133  ;;  %v137_v47 = vpop.xlane.xlu1 %136 }
 0x153   :  { %v140_v48 = vpop.xlane.xlu0 %139 }
 0x157   :  { %v143_v49 = vpop.xlane.xlu1 %142  ;;  %v220_v50 = vpop.xlane.xlu0 %219 }
 0x15b   :  { %v223_v18 = vpop.xlane.xlu1 %222  ;;  %v75_v51 = vpop.xlane.xlu0 %74 }
 0x15c   :  { %481 = vlog2.f32 %v75_v51 }
 0x15f   :  { %v78_v52 = vpop.xlane.xlu1 %77  ;;  %v81_v21 = vpop.xlane.xlu0 %80 }
 0x160   :  { %483 = vlog2.f32 %v78_v52 }
 0x161   :  { %485 = vlog2.f32 %v81_v21 }
 0x163   :  { %v229_v53 = vpop.xlane.xlu1 %228  ;;  %v84_v54 = vpop.xlane.xlu0 %83 }
 0x164   :  { %487 = vlog2.f32 %v84_v54 }
 0x166   :  { %v482_v55 = vpop.eup %481 }
 0x167   :  { %v86_v56 = vmul.f32 0.6931472, %v482_v55  ;;  %v306_v57 = vpop.xlane.xlu1 %305  ;;  %v226_v58 = vpop.xlane.xlu0 %225 }
 0x169   :  { %v93_v59 = vadd.f32 %v86_v56, %v654_v25 }
 0x16a   :  { %v484_v60 = vpop.eup %483 }
 0x16b   :  { %v486_v62 = vpop.eup %485  ;;  %v88_v63 = vmul.f32 0.6931472, %v484_v60  ;;  %v312_v3 = vpop.xlane.xlu1 %311  ;;  %v144_v10 = vsub.f32 %v93_v59, %v134_v46  ;;  %v230_v16 = vsub.f32 %v93_v59, %v220_v50 }
 0x16c   :  { %v303_v4 = vpop.xlane.xlu0 %302  ;;  %v90_v6 = vmul.f32 0.6931472, %v486_v62 }
 0x16d   :  { %v94_v8 = vadd.f32 %v88_v63, %v660_v28  ;;  %v313_v25 = vsub.f32 %v93_v59, %v303_v4  ;;  %v155_v32 = vrot.slane %v144_v10, %v154_v7  ;;  %v241_v34 = vrot.slane %v230_v16, %v154_v7 }
 0x16e   :  { %v488_v12 = vpop.eup %487  ;;  %v95_v14 = vadd.f32 %v90_v6, %v652_v24 }
 0x16f   :  { %v92_v17 = vmul.f32 0.6931472, %v488_v12  ;;  %v314_v19 = vsub.f32 %v94_v8, %v306_v57  ;;  %v389_v20 = vpop.xlane.xlu1 %388  ;;  %v145_v23 = vsub.f32 %v94_v8, %v137_v47  ;;  %v231_v26 = vsub.f32 %v94_v8, %v223_v18 }
 0x170   :  { %v309_v22 = vpop.xlane.xlu0 %308  ;;  %v232_v30 = vsub.f32 %v95_v14, %v226_v58  ;;  %v146_v28 = vsub.f32 %v95_v14, %v140_v48  ;;  %v324_v36 = vrot.slane %v313_v25, %v154_v7  ;;  %v397_v41 = vsub.f32 %v94_v8, %v389_v20 }
 0x171   :  { %v315_v31 = vsub.f32 %v95_v14, %v309_v22  ;;  %v96_v29 = vadd.f32 %v92_v17, %v658_v27  ;;  %v328_v33 = vrot.slane %v314_v19, %v159_v13  ;;  %v160_v9 = vrot.slane %v145_v23, %v159_v13 }
 0x172   :  { %v245_v24 = vrot.slane %v231_v26, %v159_v13  ;;  %v250_v40 = vrot.slane %v232_v30, %v154_v7  ;;  %v166_v11 = vrot.slane %v146_v28, %v154_v7 }
 0x173   :  { %v316_v35 = vsub.f32 %v96_v29, %v312_v3  ;;  %v395_v37 = vpop.xlane.xlu1 %394  ;;  %v147_v5 = vsub.f32 %v96_v29, %v143_v49  ;;  %v233_v39 = vsub.f32 %v96_v29, %v229_v53  ;;  %v333_v1 = vrot.slane %v315_v31, %v154_v7 }
 0x174   :  { %v386_v38 = vpop.xlane.xlu0 %385  ;;  %v399_v46 = vsub.f32 %v96_v29, %v395_v37  ;;  %v162_v47 = vsel %vm161_vm6, %v160_v9, %v155_v32  ;;  %v246_v48 = vsel %vm161_vm6, %v245_v24, %v241_v34  ;;  %v329_v50 = vsel %vm161_vm6, %v328_v33, %v324_v36 }
 0x175   :  { %v396_v43 = vsub.f32 %v93_v59, %v386_v38  ;;  %v337_v0 = vrot.slane %v316_v35, %v159_v13  ;;  %v170_v27 = vrot.slane %v147_v5, %v159_v13  ;;  %v254_v45 = vrot.slane %v233_v39, %v159_v13 }
 0x176   :  { %v411_v59 = vrot.slane %v397_v41, %v159_v13  ;;  %v420_v60 = vrot.slane %v399_v46, %v159_v13 }
 0x177   :  { %v407_v18 = vrot.slane %v396_v43, %v154_v7  ;;  %v171_v49 = vsel %vm161_vm6, %v170_v27, %v166_v11  ;;  %v255_v52 = vsel %vm161_vm6, %v254_v45, %v250_v40  ;;  %v338_v21 = vsel %vm161_vm6, %v337_v0, %v333_v1  ;;  %v264_v12 = vpop.xlane.xlu1 %263 }
 0x178   :  { %v392_v51 = vpop.xlane.xlu0 %391  ;;  %v173_v54 = vsel %vm172_vm7, %v171_v49, %v162_v47  ;;  %v256_v55 = vsel %vm172_vm7, %v255_v52, %v246_v48  ;;  %v339_v56 = vsel %vm172_vm7, %v338_v21, %v329_v50  ;;  %489 = vrcp.f32 %v264_v12 }
 0x179   :  { %v398_v53 = vsub.f32 %v95_v14, %v392_v51  ;;  %v175_v57 = vmul.f32 %v726_v42, %v173_v54  ;;  %v258_v58 = vmul.f32 %v724_v2, %v256_v55  ;;  %v341_v3 = vmul.f32 %v733_v44, %v339_v56 }
 0x17a   :  { %v412_v4 = vsel %vm161_vm6, %v411_v59, %v407_v18 }
 0x17b   :  { %v416_v61 = vrot.slane %v398_v53, %v154_v7  ;;  %v177_v62 = vsel %vm176_vm4, %v175_v57, 0.0  ;;  %v259_v63 = vsel %vm176_vm4, %v258_v58, 0.0  ;;  %v342_v2 = vsel %vm176_vm4, %v341_v3, 0.0  ;;  %v430_v13 = vpop.xlane.xlu1 %429 }
 0x17c   :  { %178 = vadd.xlane.f32.xlu0 %v177_v62  ;;  %260 = vadd.xlane.f32.xlu1 %v259_v63  ;;  %v182_v10 = vpop.xlane.xlu0 %181 }
 0x17d   :  { %v421_v6 = vsel %vm161_vm6, %v420_v60, %v416_v61  ;;  %491 = vrcp.f32 %v182_v10 }
 0x17e   :  { %v422_v8 = vsel %vm172_vm7, %v421_v6, %v412_v4 }
 0x17f   :  { %v424_v42 = vmul.f32 %v738_v15, %v422_v8 }
 0x180   :  { %343 = vadd.xlane.f32.xlu0 %v342_v2  ;;  %v347_v44 = vpop.xlane.xlu0 %346 }
 0x181   :  { %v425_v7 = vsel %vm176_vm4, %v424_v42, 0.0  ;;  %493 = vrcp.f32 %v347_v44 }
 0x182   :  { %426 = vadd.xlane.f32.xlu1 %v425_v7  ;;  %495 = vrcp.f32 %v430_v13  ;;  %v490_v14 = vpop.eup %489 }
 0x187   :  { %v492_v25 = vpop.eup %491 }
 0x18b   :  { %v494_v20 = vpop.eup %493 }
 0x18c   :  { %v496_v22 = vpop.eup %495 }
 0x209   :  { %v261_v16 = vpop.xlane.xlu1 %260  ;;  %v179_v17 = vpop.xlane.xlu0 %178 }
 0x20a   :  { %v266_v19 = vmul.f32 %v490_v14, %v261_v16  ;;  %v184_v15 = vmul.f32 %v492_v25, %v179_v17 }
 0x20c   :  { %v267_v26 = vmin.f32 %v184_v15, %v266_v19 }
 0x20d   :  { %v344_v23 = vpop.xlane.xlu0 %343 }
 0x20e   :  { %v349_v30 = vmul.f32 %v494_v20, %v344_v23 }
 0x20f   :  { %v427_v31 = vpop.xlane.xlu1 %426 }
 0x210   :  { %v432_v29 = vmul.f32 %v496_v22, %v427_v31  ;;  %v350_v28 = vmin.f32 %v267_v26, %v349_v30 }
 0x212   :  { %v433_v32 = vmin.f32 %v350_v28, %v432_v29 }
 0x214   :  { %v435_v33 = vsel %vm434_vm8, %v433_v32, 0.0 }
 0x215   :  { %v436_v9 = vrot.slane %v435_v33, 4 }
 0x217   :  { %v437_v34 = vadd.f32 %v436_v9, %v435_v33 }
 0x219   :  { %v438_v24 = vrot.slane %v437_v34, 2 }
 0x21b   :  { %v439_v35 = vadd.f32 %v438_v24, %v437_v34 }
 0x21d   :  { %v440_v36 = vrot.slane %v439_v35, 1 }
 0x21f   :  { %v441_v37 = vadd.f32 %v440_v36, %v439_v35 }
 0x221   :  { %v442_v38 = vmul.f32 0.5, %v441_v37 }
 0x223   :  { %444 = vst.msk [vmem:[#allocation7] sm:$0x1] %vm443_vm9, %v442_v38 }
 0x224   :  { %552 = shalt.err (!%p549_p6)
}
 0x225   :  { %s553_s13 = scalar_lea.hbm %s784_s2, 16 }
 0x226   :  { %p554_p7 = scmp.ne.s32.totalorder %s784_s2, %s553_s13  ;;  %p557_p8 = scmp.lt.u32.totalorder %s553_s13, %s784_s2 }
 0x228   :  { %p559_p9 = pnand %p557_p8, %p554_p7 }
 0x22a   :  { %562 = shalt.err (!%p559_p9)
}
 0x22b   :  { %454 = dma.vmem_to_hbm [thread:$0]  %s452_s8, 16, %s784_s2, [#allocation4]  }
 0x22c   :  { %567 = dma.done.wait [#allocation4], 16  }
 0x22d   :  { %568 = vsyncadd [#allocation4], 4294967280 }
 0x22e   :  { %458 = vsyncpa [#allocation3], 1 }
 0x22f   :  { %459 = vsyncpa [#allocation6], 1 }
 0x230   :  { %460 = vsyncpa [#allocation4], 1 }

</bundles_post_ra>
